<compile_context>
chip_gen: v7x
topology: tpu7x:2x2x1
jax: 0.10.0
libtpu: 0.0.40
codegen_flags: <defaults>
</compile_context>

<pallas_src>
import math

import jax
import jax.numpy as jnp
from jax.experimental import pallas as pl
from jax.experimental.pallas import tpu as pltpu


def make_positional_encoding(d_model: int, max_len: int = 1000,
                             dtype=jnp.float32) -> jnp.ndarray:
    """Builds the (max_len, 1, d_model) pe buffer (matches the PyTorch init).

    One-time buffer setup (not forward-pass work), so it is plain JAX.  Handles odd
    d_model and stores pe directly in the activation dtype.
    """
    position = jnp.arange(0, max_len, dtype=jnp.float32)[:, None]            # (L, 1)
    div_term = jnp.exp(
        jnp.arange(0, d_model, 2, dtype=jnp.float32) * (-math.log(10000.0) / d_model)
    )                                                                         # (ceil(D/2),)
    pe = jnp.zeros((max_len, d_model), dtype=jnp.float32)
    pe = pe.at[:, 0::2].set(jnp.sin(position * div_term))
    pe = pe.at[:, 1::2].set(jnp.cos(position * div_term[: d_model // 2]))     # odd-D safe
    return pe[:, None, :].astype(dtype)                                       # (L, 1, D)


def _pe_add_kernel(x_ref, pe_ref, o_ref):
    # x_ref / o_ref : (tile_s, tile_b, D) tiles in VMEM
    # pe_ref        : (tile_s, 1, D) tile, broadcast-added over the batch axis (VPU).
    o_ref[...] = x_ref[...] + pe_ref[...]


def _choose_tiles(S, B, D, itemsize, target_bytes=2 << 20):
    """Pick (tile_s, tile_b) so one VMEM buffer (sublane dim padded to 8) is ~target.

    Legality: tile_b is the full batch or a multiple of 8; tile_s is the full seq or a
    multiple of 8; d_model is never tiled (the full last dim is always legal).
    """
    pad8 = lambda n: -(-n // 8) * 8
    row_bytes = D * itemsize                       # one (1, 1, D) row
    full_b_rowgroup = 8 * pad8(B) * row_bytes      # 8 seq rows x full (padded) batch

    if B <= 8 or full_b_rowgroup <= target_bytes:
        tile_b = B                                 # keep full batch in each tile
    else:
        tile_b = min(B, max(8, (target_bytes // (8 * row_bytes)) // 8 * 8))

    rows = target_bytes // (pad8(tile_b) * row_bytes)
    if rows >= S:
        tile_s = S
    else:
        tile_s = min(S, max(8, (rows // 8) * 8))
    return tile_s, tile_b


_XLA_FALLBACK_ELEMS = 1 << 15  # below this, pallas_call overhead dwarfs the work


def positional_encoding_forward(x: jnp.ndarray, pe: jnp.ndarray, *,
                                tile_s: int | None = None,
                                tile_b: int | None = None,
                                force_pallas: bool = False) -> jnp.ndarray:
    """x: (seq_len, batch, d_model); pe: (max_len, 1, d_model) or (max_len, d_model)."""
    S, B, D = x.shape
    if pe.ndim == 2:
        pe = pe[:, None, :]
    max_len = pe.shape[0]
    if S > max_len:
        raise ValueError(f"seq_len={S} exceeds positional-encoding max_len={max_len}")
    if pe.shape[2] != D:
        raise ValueError(f"d_model mismatch: x has {D}, pe has {pe.shape[2]}")
    if pe.dtype != x.dtype:
        pe = pe.astype(x.dtype)

    # Tiny problems: let XLA fuse the broadcast add (kernel launch overhead dominates).
    if (not force_pallas and tile_s is None and tile_b is None
            and x.size <= _XLA_FALLBACK_ELEMS):
        return x + pe[:S]

    if tile_s is None or tile_b is None:
        ts, tb = _choose_tiles(S, B, D, x.dtype.itemsize)
        tile_s = ts if tile_s is None else tile_s
        tile_b = tb if tile_b is None else tile_b

    # Grid: seq tiles (slow axis), batch tiles (fast axis).  The pe block index is
    # constant across the fast batch axis -> pe tile stays resident, no re-DMA.
    grid = (pl.cdiv(S, tile_s), pl.cdiv(B, tile_b))

    return pl.pallas_call(
        _pe_add_kernel,
        out_shape=jax.ShapeDtypeStruct((S, B, D), x.dtype),
        grid=grid,
        in_specs=[
            pl.BlockSpec((tile_s, tile_b, D), lambda i, b: (i, b, 0)),   # x
            pl.BlockSpec((tile_s, 1, D), lambda i, b: (i, 0, 0)),        # pe (windowed)
        ],
        out_specs=pl.BlockSpec((tile_s, tile_b, D), lambda i, b: (i, b, 0)),
        compiler_params=pltpu.CompilerParams(
            dimension_semantics=("parallel", "parallel"),  # v7x: shard over both TCs
            vmem_limit_bytes=32 << 20,
        ),
    )(x, pe)


if __name__ == "__main__":
    max_len = 1000
    key = jax.random.PRNGKey(0)

    # Case 1: tiny shape matching the PyTorch module convention (S, B, D) = (8, 2, 32),
    # forced through the Pallas kernel (single-block grid) to exercise it.
    S1, B1, D1 = 8, 2, 32
    pe1 = make_positional_encoding(D1, max_len)
    x1 = jax.random.normal(key, (S1, B1, D1), dtype=jnp.float32)
    out1 = jax.block_until_ready(positional_encoding_forward(x1, pe1, force_pallas=True))
    ref1 = x1 + pe1[:S1]
    assert out1.shape == (S1, B1, D1)
    assert jnp.allclose(out1, ref1, atol=1e-6, rtol=1e-6)

    # Case 2: multi-tile grid (2 seq blocks x 2 batch blocks), lane-dense d_model=128,
    # exercising the resident pe tile across the batch grid axis.
    S2, B2, D2 = 64, 16, 128
    pe2 = make_positional_encoding(D2, max_len)
    x2 = jax.random.normal(jax.random.fold_in(key, 1), (S2, B2, D2), dtype=jnp.float32)
    out2 = jax.block_until_ready(
        positional_encoding_forward(x2, pe2, tile_s=32, tile_b=8))
    ref2 = x2 + pe2[:S2]
    assert out2.shape == (S2, B2, D2)
    assert jnp.allclose(out2, ref2, atol=1e-6, rtol=1e-6)

    # Case 3: auto-chosen tiles on a mid-size problem (no manual tile override).
    S3, B3, D3 = 128, 8, 256
    pe3 = make_positional_encoding(D3, max_len)
    x3 = jax.random.normal(jax.random.fold_in(key, 2), (S3, B3, D3), dtype=jnp.float32)
    out3 = jax.block_until_ready(positional_encoding_forward(x3, pe3))
    ref3 = x3 + pe3[:S3]
    assert out3.shape == (S3, B3, D3)
    assert jnp.allclose(out3, ref3, atol=1e-6, rtol=1e-6)

    print("KERNEL_OK")
</pallas_src>

<mosaic_0001>
module attributes {stable_mosaic.version = 11 : i64} {
  func.func @_pe_add_kernel(%arg0: i32, %arg1: i32, %arg2: memref<8x2x32xf32, #tpu.memory_space<vmem>>, %arg3: memref<8x1x32xf32, #tpu.memory_space<vmem>>, %arg4: memref<8x2x32xf32, #tpu.memory_space<vmem>>) attributes {dimension_semantics = [#tpu.dimension_semantics<parallel>, #tpu.dimension_semantics<parallel>], iteration_bounds = array<i64: 1, 1>, scalar_prefetch = 0 : i64, scratch_operands = 0 : i64, tpu.core_type = #tpu.core_type<tc>, window_params = [{transform_indices = @transform_0, window_bounds = array<i64: 8, 2, 32>}, {transform_indices = @transform_1, window_bounds = array<i64: 8, 1, 32>}, {transform_indices = @transform_2, window_bounds = array<i64: 8, 2, 32>}]} {
    %c0 = arith.constant 0 : index
    %c0_0 = arith.constant 0 : index
    %c0_1 = arith.constant 0 : index
    %0 = vector.load %arg2[%c0, %c0_0, %c0_1] : memref<8x2x32xf32, #tpu.memory_space<vmem>>, vector<8x2x32xf32>
    %c0_2 = arith.constant 0 : index
    %c0_3 = arith.constant 0 : index
    %c0_4 = arith.constant 0 : index
    %1 = vector.load %arg3[%c0_2, %c0_3, %c0_4] : memref<8x1x32xf32, #tpu.memory_space<vmem>>, vector<8x1x32xf32>
    %2 = vector.broadcast %1 : vector<8x1x32xf32> to vector<8x2x32xf32>
    %3 = arith.addf %0, %2 : vector<8x2x32xf32>
    %c0_5 = arith.constant 0 : index
    %c0_6 = arith.constant 0 : index
    %c0_7 = arith.constant 0 : index
    %4 = vector.load %arg4[%c0_5, %c0_6, %c0_7] : memref<8x2x32xf32, #tpu.memory_space<vmem>>, vector<8x2x32xf32>
    tpu.vector_store %arg4[%c0_5, %c0_6, %c0_7], %3 {strides = array<i32>} : memref<8x2x32xf32, #tpu.memory_space<vmem>>, vector<8x2x32xf32>,
    return
  }
  func.func @transform_0(%arg0: i32, %arg1: i32) -> (i32, i32, i32) {
    %c0_i32 = arith.constant 0 : i32
    %c0_i32_0 = arith.constant 0 : i32
    return %arg0, %arg1, %c0_i32 : i32, i32, i32
  }
  func.func @transform_1(%arg0: i32, %arg1: i32) -> (i32, i32, i32) {
    %c0_i32 = arith.constant 0 : i32
    %c0_i32_0 = arith.constant 0 : i32
    %c0_i32_1 = arith.constant 0 : i32
    return %arg0, %c0_i32, %c0_i32_0 : i32, i32, i32
  }
  func.func @transform_2(%arg0: i32, %arg1: i32) -> (i32, i32, i32) {
    %c0_i32 = arith.constant 0 : i32
    %c0_i32_0 = arith.constant 0 : i32
    return %arg0, %arg1, %c0_i32 : i32, i32, i32
  }
}

</mosaic_0001>

<bundles_post_ra>
// kernel: tpu_custom_call.1
= control target key start
LH: loop header
LB: loop body
LE: loop exit
PB: predicated region body
PF: predicated region fallthrough
CT: control target
= control target key end

     0   :  { %vm84_vm0 = vcmask 254976   ;;  %s230_s0 = inlined_call_operand.vmem [shape: f32[8,2,32], index: 0, kind: input, shape index: {}]   ;;  %s231_s1 = inlined_call_operand.vmem [shape: f32[1000,1,32], index: 1, kind: input, shape index: {}]   ;;  %s232_s2 = inlined_call_operand.hbm [shape: f32[8,2,32], index: 2, kind: output, shape index: {}]  }
   0x1   :  { %v12_v0 = vld [vmem:[%s230_s0] sm:$0x3]  ;;  %v13_v3 = vld [vmem:[%s230_s0 + $0x2] sm:$0x3]  ;;  %v14_v5 = vld [vmem:[%s230_s0 + $0x4] sm:$0x3] }
   0x2   :  { %v109_v1 = vld [vmem:[%s231_s1] ss:$0 sm:$0xff]  ;;  %v110_v4 = vld [vmem:[%s231_s1 + $0x1] ss:$0 sm:$0xff]  ;;  %v111_v7 = vld [vmem:[%s231_s1 + $0x2] ss:$0 sm:$0xff] }
   0x3   :  { %v76_v2 = vadd.f32 %v109_v1, %v12_v0  ;;  %v77_v6 = vadd.f32 %v110_v4, %v13_v3  ;;  %v15_v8 = vld [vmem:[%s230_s0 + $0x6] sm:$0x3]  ;;  %v112_v9 = vld [vmem:[%s231_s1 + $0x3] ss:$0 sm:$0xff]  ;;  %v78_v10 = vadd.f32 %v111_v7, %v14_v5  ;;  %v16_v12 = vld [vmem:[%s230_s0 + $0x8] sm:$0x3] }
   0x4   :  { %v79_v11 = vadd.f32 %v112_v9, %v15_v8  ;;  %v113_v13 = vld [vmem:[%s231_s1 + $0x4] ss:$0 sm:$0xff]  ;;  %v17_v14 = vld [vmem:[%s230_s0 + $0xa] sm:$0x3]  ;;  %v114_v16 = vld [vmem:[%s231_s1 + $0x5] ss:$0 sm:$0xff] }
   0x5   :  { %85 = vst.msk [vmem:[#allocation2] sm:$0x3] %vm84_vm0, %v76_v2  ;;  %86 = vst.msk [vmem:[#allocation2 + $0x2] sm:$0x3] %vm84_vm0, %v77_v6  ;;  %v80_v15 = vadd.f32 %v113_v13, %v16_v12  ;;  %v18_v17 = vld [vmem:[%s230_s0 + $0xc] sm:$0x3]  ;;  %v81_v19 = vadd.f32 %v114_v16, %v17_v14 }
   0x6   :  { %v115_v18 = vld [vmem:[%s231_s1 + $0x6] ss:$0 sm:$0xff]  ;;  %87 = vst.msk [vmem:[#allocation2 + $0x4] sm:$0x3] %vm84_vm0, %v78_v10  ;;  %88 = vst.msk [vmem:[#allocation2 + $0x6] sm:$0x3] %vm84_vm0, %v79_v11 }
   0x7   :  { %v82_v20 = vadd.f32 %v115_v18, %v18_v17  ;;  %v19_v21 = vld [vmem:[%s230_s0 + $0xe] sm:$0x3]  ;;  %v116_v22 = vld [vmem:[%s231_s1 + $0x7] ss:$0 sm:$0xff] }
   0x8   :  { %7 = vsyncpa [#allocation3], 0  ;;  %89 = vst.msk [vmem:[#allocation2 + $0x8] sm:$0x3] %vm84_vm0, %v80_v15  ;;  %v83_v23 = vadd.f32 %v116_v22, %v19_v21  ;;  %s144_s13 = smov [#allocation2]  }
   0x9   :  { %s98_s14 = sshll.u32 %s144_s13, 4  ;;  %90 = vst.msk [vmem:[#allocation2 + $0xa] sm:$0x3] %vm84_vm0, %v81_v19  ;;  %91 = vst.msk [vmem:[#allocation2 + $0xc] sm:$0x3] %vm84_vm0, %v82_v20  ;;  %s99_s14 = int_to_ptr.vmem [resolvable:$true] %s98_s14 }
   0xa   :  { %92 = vst.msk [vmem:[#allocation2 + $0xe] sm:$0x3] %vm84_vm0, %v83_v23  ;;  %s120_s15 = scalar_lea.vmem %s99_s14, 256  ;;  %p125_p1 = scmp.lt.s32.totalorder %s99_s14, %s99_s14 }
   0xb   :  { %p121_p0 = scmp.ne.s32.totalorder %s99_s14, %s120_s15  ;;  %p126_p2 = scmp.lt.s32.totalorder %s120_s15, %s120_s15 }
   0xd   :  { %p127_p3 = por %p126_p2, %p125_p1 }
   0xf   :  { %p128_p4 = pnand %p127_p3, %p121_p0 }
  0x11   :  { %131 = shalt.err (!%p128_p4)
}
  0x12   :  { %s132_s16 = scalar_lea.hbm %s232_s2, 256 }
  0x13   :  { %p133_p5 = scmp.ne.s32.totalorder %s232_s2, %s132_s16  ;;  %p136_p6 = scmp.lt.u32.totalorder %s132_s16, %s232_s2 }
  0x15   :  { %p138_p7 = pnand %p136_p6, %p133_p5 }
  0x17   :  { %141 = shalt.err (!%p138_p7)
}
  0x18   :  { %s145_s21 = smov 32   ;;  %s146_s22 = smov 2  }
  0x19   :  { %104 = dma.vmem_to_hbm [thread:$0]  %s99_s14, 256, %s232_s2, [#allocation3], %s145_s21, %s145_s21, %s146_s22  }
  0x1a   :  { %142 = dma.done.wait [#allocation3], 256  }
  0x1b   :  { %143 = vsyncadd [#allocation3], 4294967040 }
  0x1c   :  { %108 = vsyncpa [#allocation3], 1 }

</bundles_post_ra>
